<compile_context>
chip_gen: v5e
topology: v5e:2x2
jax: 0.10.0
libtpu: 0.0.40
codegen_flags: <defaults>
</compile_context>

<pallas_src>
import jax
import jax.numpy as jnp
from jax.experimental import pallas as pl
from jax.experimental.pallas import tpu as pltpu


def _round_up(n, m):
    return ((n + m - 1) // m) * m


def actor_kernel(x_ref, w1_ref, b1_ref, w2_ref, b2_ref, o_ref):
    # x_ref: (TILE_B, F)   w1_ref: (H, F)   b1_ref: (H, 1)   w2_ref: (H, 1)
    # b2_ref: (1, 1) in SMEM                o_ref: (1, TILE_B)
    # fc1 with batch on the lane axis: hT[h, b] = sum_f w1[h, f] * x[b, f]
    hT = jax.lax.dot_general(
        w1_ref[...], x_ref[...],
        dimension_numbers=(((1,), (1,)), ((), ())),
        preferred_element_type=jnp.float32)                  # (H, TILE_B), MXU
    hT = jnp.maximum(hT + b1_ref[...], 0.0)                  # bias + ReLU, VPU
    # fc2: elementwise multiply + sublane reduction instead of a 1-column MXU matmul.
    out = jnp.sum(hT * w2_ref[...], axis=0, keepdims=True)   # (1, TILE_B)
    o_ref[...] = out + b2_ref[0, 0]                          # lane-dense store


def actor_net_forward(x, w1, b1, w2, b2, *, max_tile_b=1024):
    """ActorNet forward.

    x:  (B, F) float32
    w1: (H, F) float32   (PyTorch fc1.weight layout: (out_features, in_features))
    b1: (H, 1) float32
    w2: (H, 1) float32   (fc2.weight transposed)
    b2: (1, 1) float32
    returns (B, 1) float32
    """
    B, F = x.shape
    H = w1.shape[0]

    # Batch tile: full (8-padded) batch if small, else 1024-row lane-aligned tiles.
    tile_b = min(max_tile_b, _round_up(B, 8))
    b_padded = _round_up(B, tile_b)
    if b_padded != B:
        x = jnp.pad(x, ((0, b_padded - B), (0, 0)))
    grid = (b_padded // tile_b,)

    out = pl.pallas_call(
        actor_kernel,
        out_shape=jax.ShapeDtypeStruct((1, b_padded), jnp.float32),
        grid=grid,
        in_specs=[
            pl.BlockSpec((tile_b, F), lambda i: (i, 0)),          # x: streamed tile
            pl.BlockSpec((H, F), lambda i: (0, 0)),               # w1: resident
            pl.BlockSpec((H, 1), lambda i: (0, 0)),               # b1: resident
            pl.BlockSpec((H, 1), lambda i: (0, 0)),               # w2: resident
            pl.BlockSpec(memory_space=pltpu.MemorySpace.SMEM),    # b2 scalar
        ],
        out_specs=pl.BlockSpec((1, tile_b), lambda i: (0, i)),
        compiler_params=pltpu.CompilerParams(
            dimension_semantics=("parallel",),
            vmem_limit_bytes=32 * 1024 * 1024,
        ),
    )(x, w1, b1, w2, b2)

    return out[0, :B].reshape(B, 1)


def init_params(key, n_features, n_a_hidden):
    """Match PyTorch init: weight ~ N(0, 0.1); bias ~ U(-1/sqrt(fan_in), 1/sqrt(fan_in))."""
    k1, k2, k3, k4 = jax.random.split(key, 4)
    w1 = 0.1 * jax.random.normal(k1, (n_a_hidden, n_features), jnp.float32)  # fc1.weight
    bound1 = 1.0 / jnp.sqrt(jnp.float32(n_features))
    b1 = jax.random.uniform(k2, (n_a_hidden, 1), jnp.float32, -bound1, bound1)
    w2 = 0.1 * jax.random.normal(k3, (n_a_hidden, 1), jnp.float32)           # fc2.weight.T
    bound2 = 1.0 / jnp.sqrt(jnp.float32(n_a_hidden))
    b2 = jax.random.uniform(k4, (1, 1), jnp.float32, -bound2, bound2)
    return w1, b1, w2, b2


if __name__ == "__main__":
    n_features = 16
    n_a_hidden = 32

    key = jax.random.PRNGKey(0)
    kx1, kx2, kp = jax.random.split(key, 3)
    w1, b1, w2, b2 = init_params(kp, n_features, n_a_hidden)

    def ref_forward(x):
        h = jnp.maximum(
            jnp.einsum("bf,hf->bh", x, w1, precision=jax.lax.Precision.HIGHEST) + b1.T,
            0.0)
        return jnp.einsum("bh,ho->bo", h, w2, precision=jax.lax.Precision.HIGHEST) + b2

    # Small case (single tile) and a multi-tile + padded case to exercise the grid.
    for kx, batch in ((kx1, 8), (kx2, 1500)):
        x = jax.random.normal(kx, (batch, n_features), jnp.float32)
        out = jax.block_until_ready(actor_net_forward(x, w1, b1, w2, b2))
        ref = ref_forward(x)
        assert out.shape == (batch, 1)
        assert jnp.allclose(out, ref, atol=1e-4, rtol=1e-4), float(
            jnp.max(jnp.abs(out - ref)))

    print("KERNEL_OK")
</pallas_src>

<mosaic_0001>
module attributes {stable_mosaic.version = 11 : i64} {
  func.func @actor_kernel(%arg0: i32, %arg1: memref<8x16xf32, #tpu.memory_space<vmem>>, %arg2: memref<32x16xf32, #tpu.memory_space<vmem>>, %arg3: memref<32x1xf32, #tpu.memory_space<vmem>>, %arg4: memref<32x1xf32, #tpu.memory_space<vmem>>, %arg5: memref<1x1xf32, #tpu.memory_space<smem>>, %arg6: memref<1x8xf32, #tpu.memory_space<vmem>>) attributes {dimension_semantics = [#tpu.dimension_semantics<parallel>], iteration_bounds = array<i64: 1>, scalar_prefetch = 0 : i64, scratch_operands = 0 : i64, tpu.core_type = #tpu.core_type<tc>, window_params = [{transform_indices = @transform_0, window_bounds = array<i64: 8, 16>}, {pipeline_mode = #tpu.pipeline_mode<synchronous>, transform_indices = @transform_1, window_bounds = array<i64: 32, 16>}, {pipeline_mode = #tpu.pipeline_mode<synchronous>, transform_indices = @transform_2, window_bounds = array<i64: 32, 1>}, {pipeline_mode = #tpu.pipeline_mode<synchronous>, transform_indices = @transform_3, window_bounds = array<i64: 32, 1>}, {transform_indices = @transform_4, window_bounds = array<i64: 1, 1>}, {transform_indices = @transform_5, window_bounds = array<i64: 1, 8>}]} {
    %c0 = arith.constant 0 : index
    %c0_0 = arith.constant 0 : index
    %0 = vector.load %arg2[%c0, %c0_0] : memref<32x16xf32, #tpu.memory_space<vmem>>, vector<32x16xf32>
    %c0_1 = arith.constant 0 : index
    %c0_2 = arith.constant 0 : index
    %1 = vector.load %arg1[%c0_1, %c0_2] : memref<8x16xf32, #tpu.memory_space<vmem>>, vector<8x16xf32>
    %cst = arith.constant dense<0.000000e+00> : vector<32x8xf32>
    %2 = tpu.matmul %0, %1, %cst {dimension_numbers = #tpu.dot_dimension_numbers<[1], [1], [0], [0], [0, 0, 1, 0], [], []>} : vector<32x16xf32>, vector<8x16xf32>, vector<32x8xf32> -> vector<32x8xf32>
    %c0_3 = arith.constant 0 : index
    %c0_4 = arith.constant 0 : index
    %3 = vector.load %arg3[%c0_3, %c0_4] : memref<32x1xf32, #tpu.memory_space<vmem>>, vector<32x1xf32>
    %4 = vector.broadcast %3 : vector<32x1xf32> to vector<32x8xf32>
    %5 = arith.addf %2, %4 : vector<32x8xf32>
    %cst_5 = arith.constant 0.000000e+00 : f32
    %6 = vector.broadcast %cst_5 : f32 to vector<32x8xf32>
    %7 = arith.maximumf %5, %6 : vector<32x8xf32>
    %c0_6 = arith.constant 0 : index
    %c0_7 = arith.constant 0 : index
    %8 = vector.load %arg4[%c0_6, %c0_7] : memref<32x1xf32, #tpu.memory_space<vmem>>, vector<32x1xf32>
    %9 = vector.broadcast %8 : vector<32x1xf32> to vector<32x8xf32>
    %10 = arith.mulf %7, %9 : vector<32x8xf32>
    %cst_8 = arith.constant dense<0.000000e+00> : vector<8xf32>
    %11 = vector.multi_reduction <add>, %10, %cst_8 [0] : vector<32x8xf32> to vector<8xf32>
    %12 = vector.shape_cast %11 : vector<8xf32> to vector<1x8xf32>
    %c0_9 = arith.constant 0 : index
    %c0_10 = arith.constant 0 : index
    %13 = memref.load %arg5[%c0_9, %c0_10] : memref<1x1xf32, #tpu.memory_space<smem>>
    %14 = vector.broadcast %13 : f32 to vector<1x8xf32>
    %15 = arith.addf %12, %14 : vector<1x8xf32>
    %c0_11 = arith.constant 0 : index
    %c0_12 = arith.constant 0 : index
    %16 = vector.load %arg6[%c0_11, %c0_12] : memref<1x8xf32, #tpu.memory_space<vmem>>, vector<1x8xf32>
    tpu.vector_store %arg6[%c0_11, %c0_12], %15 {strides = array<i32>} : memref<1x8xf32, #tpu.memory_space<vmem>>, vector<1x8xf32>,
    return
  }
  func.func @transform_0(%arg0: i32) -> (i32, i32) {
    %c0_i32 = arith.constant 0 : i32
    %c0_i32_0 = arith.constant 0 : i32
    return %arg0, %c0_i32 : i32, i32
  }
  func.func @transform_1(%arg0: i32) -> (i32, i32) {
    %c0_i32 = arith.constant 0 : i32
    %c0_i32_0 = arith.constant 0 : i32
    %c0_i32_1 = arith.constant 0 : i32
    return %c0_i32, %c0_i32_0 : i32, i32
  }
  func.func @transform_2(%arg0: i32) -> (i32, i32) {
    %c0_i32 = arith.constant 0 : i32
    %c0_i32_0 = arith.constant 0 : i32
    %c0_i32_1 = arith.constant 0 : i32
    return %c0_i32, %c0_i32_0 : i32, i32
  }
  func.func @transform_3(%arg0: i32) -> (i32, i32) {
    %c0_i32 = arith.constant 0 : i32
    %c0_i32_0 = arith.constant 0 : i32
    %c0_i32_1 = arith.constant 0 : i32
    return %c0_i32, %c0_i32_0 : i32, i32
  }
  func.func @transform_4(%arg0: i32) -> (i32, i32) {
    %c0_i32 = arith.constant 0 : i32
    %c0_i32_0 = arith.constant 0 : i32
    %c0_i32_1 = arith.constant 0 : i32
    return %c0_i32, %c0_i32_0 : i32, i32
  }
  func.func @transform_5(%arg0: i32) -> (i32, i32) {
    %c0_i32 = arith.constant 0 : i32
    %c0_i32_0 = arith.constant 0 : i32
    return %c0_i32, %arg0 : i32, i32
  }
}

</mosaic_0001>

<bundles_post_ra>
// kernel: tpu_custom_call.1
= control target key start
LH: loop header
LB: loop body
LE: loop exit
PB: predicated region body
PF: predicated region fallthrough
CT: control target
= control target key end

     0   :  { %vm51_vm0 = vcmask 130048   ;;  %v202_v1 = vmov 0   ;;  %s291_s0 = inlined_call_operand.vmem [shape: f32[8,16], index: 0, kind: input, shape index: {}]   ;;  %s292_s1 = inlined_call_operand.vmem [shape: f32[32,16], index: 1, kind: input, shape index: {}]   ;;  %s293_s2 = inlined_call_operand.vmem [shape: f32[32,1], index: 2, kind: input, shape index: {}]   ;;  %s294_s3 = inlined_call_operand.vmem [shape: f32[32,1], index: 3, kind: input, shape index: {}]   ;;  %s295_s4 = inlined_call_operand.<no memory space> [shape: f32[1,1], index: 4, kind: input, shape index: {}]   ;;  %s296_s5 = inlined_call_operand.hbm [shape: f32[1,8], index: 5, kind: output, shape index: {}]  }
   0x1   :  { %v26_v0 = vld [vmem:[%s291_s0] sm:$0xff]  ;;  %174 = vset.pattern.permute.xlu1 %v202_v1  ;;  %173 = vset.pattern.permute.xlu0 %v202_v1  ;;  %v29_v2 = vld [vmem:[%s293_s2 + $0x10] sm:$0xff]  ;;  %v23_v5 = vld [vmem:[%s292_s1 + $0x8] sm:$0xff] }
   0x2   :  { %v27_v3 = vld [vmem:[%s293_s2] sm:$0xff]  ;;  %163 = vmatpush.xpose.msk.msra.mxu0 %vm51_vm0, %v26_v0  ;;  %168 = vmatpush.xpose.msk.msra.mxu1 %vm51_vm0, %v26_v0  ;;  %v24_v6 = vld [vmem:[%s292_s1 + $0x10] sm:$0xff]  ;;  %v25_v7 = vld [vmem:[%s292_s1 + $0x18] sm:$0xff] }
   0x3   :  { %v22_v4 = vld [vmem:[%s292_s1] sm:$0xff]  ;;  %169 = vmatpush.xpose.msk.msra.mxu2 %vm51_vm0, %v26_v0  ;;  %170 = vmatpush.xpose.msk.msra.mxu3 %vm51_vm0, %v26_v0 }
   0x4   :  { %43 = vperm.xlu1 %174, %v29_v2   ;;  %33 = vperm.xlu0 %173, %v27_v3  }
   0x5   :  { %11 = vsyncpa [#allocation4], 0  ;;  %164 = vmatmul.msk.f32.vlgmr.msra.gmra.mxu0 %vm51_vm0, %v22_v4  ;;  %165 = vmatmul.msk.f32.vlgmr.msra.gmra.mxu1 %vm51_vm0, %v23_v5  ;;  %v100_v8 = vld [vmem:[%s294_s3] sm:$0xff]  ;;  %v30_v9 = vld [vmem:[%s293_s2 + $0x18] sm:$0xff]  ;;  %vm128_vm1 = vcmask 64512   ;;  %v143_v50 = vstv %s295_s4  ;;  %s203_s17 = smov [#allocation3]  }
   0x6   :  { %166 = vmatmul.msk.f32.vlgmr.msra.gmra.mxu2 %vm51_vm0, %v24_v6  ;;  %167 = vmatmul.msk.f32.vlgmr.msra.gmra.mxu3 %vm51_vm0, %v25_v7  ;;  %v28_v10 = vld [vmem:[%s293_s2 + $0x8] sm:$0xff]  ;;  %v103_v12 = vld [vmem:[%s294_s3 + $0x18] sm:$0xff]  ;;  %v102_v13 = vld [vmem:[%s294_s3 + $0x10] sm:$0xff]  ;;  %s152_s18 = sshll.u32 %s203_s17, 4  ;;  %s154_s21 = sshll.u32 %s296_s5, 4  ;;  %vm145_vm2 = vcmask 57344   ;;  %s153_s18 = int_to_ptr.vmem [resolvable:$true] %s152_s18  ;;  %s155_s21 = int_to_ptr.hbm [resolvable:$true] %s154_s21 }
   0x7   :  { %175 = vset.pattern.permute.xlu2 %v202_v1  ;;  %v101_v11 = vld [vmem:[%s294_s3 + $0x8] sm:$0xff] }
   0x8   :  { %106 = vperm.xlu2 %175, %v100_v8  }
   0xc   :  { %48 = vperm.xlu1 %174, %v30_v9   ;;  %38 = vperm.xlu0 %173, %v28_v10  }
  0x10   :  { %111 = vperm.xlu2 %175, %v101_v11  }
  0x14   :  { %121 = vperm.xlu1 %174, %v103_v12   ;;  %116 = vperm.xlu0 %173, %v102_v13  }
  0x62   :  { %v107_v16 = vpop.permute.xlu2 %106 }
  0x6a   :  { %v112_v25 = vpop.permute.xlu2 %111 }
  0x76   :  { %v34_v14 = vpop.permute.xlu0 %33  ;;  %v44_v15 = vpop.permute.xlu1 %43 }
  0x7e   :  { %v39_v17 = vpop.permute.xlu0 %38  ;;  %v49_v20 = vpop.permute.xlu1 %48 }
  0x82   :  { %v84_v18 = vpop.f32.mrf.mxu0  ;;  %v87_v19 = vpop.f32.mrf.mxu1 }
  0x83   :  { %v85_v21 = vadd.f32 %v84_v18, %v34_v14  ;;  %v88_v22 = vadd.f32 %v87_v19, %v39_v17 }
  0x85   :  { %v96_v23 = vmax.f32 %v85_v21, 0.0  ;;  %v97_v24 = vmax.f32 %v88_v22, 0.0 }
  0x86   :  { %v122_v36 = vpop.permute.xlu1 %121  ;;  %v117_v37 = vpop.permute.xlu0 %116 }
  0x87   :  { %v124_v26 = vmul.f32 %v107_v16, %v96_v23  ;;  %v125_v27 = vmul.f32 %v112_v25, %v97_v24 }
  0x89   :  { %v90_v28 = vpop.f32.mrf.mxu2  ;;  %v93_v29 = vpop.f32.mrf.mxu3  ;;  %v129_v32 = vsel %vm128_vm1, %v124_v26, 0.0  ;;  %v130_v33 = vsel %vm128_vm1, %v125_v27, 0.0 }
  0x8a   :  { %v91_v30 = vadd.f32 %v90_v28, %v44_v15  ;;  %v94_v31 = vadd.f32 %v93_v29, %v49_v20  ;;  %v131_v40 = vadd.f32 %v130_v33, %v129_v32 }
  0x8c   :  { %v98_v34 = vmax.f32 %v91_v30, 0.0  ;;  %v99_v35 = vmax.f32 %v94_v31, 0.0 }
  0x8e   :  { %v126_v38 = vmul.f32 %v117_v37, %v98_v34  ;;  %v127_v39 = vmul.f32 %v122_v36, %v99_v35 }
  0x90   :  { %v132_v41 = vsel %vm128_vm1, %v126_v38, 0.0  ;;  %v134_v43 = vsel %vm128_vm1, %v127_v39, 0.0 }
  0x91   :  { %v133_v42 = vadd.f32 %v132_v41, %v131_v40 }
  0x93   :  { %v135_v44 = vadd.f32 %v134_v43, %v133_v42 }
  0x95   :  { %v136_v45 = vrot.slane %v135_v44, 4 }
  0x97   :  { %v137_v46 = vadd.f32 %v136_v45, %v135_v44 }
  0x99   :  { %v138_v47 = vrot.slane %v137_v46, 2 }
  0x9b   :  { %v139_v48 = vadd.f32 %v138_v47, %v137_v46 }
  0x9d   :  { %v140_v49 = vrot.slane %v139_v48, 1 }
  0x9f   :  { %v141_v51 = vadd.f32 %v140_v49, %v139_v48 }
  0xa1   :  { %v144_v52 = vadd.f32 %v143_v50, %v141_v51 }
  0xa3   :  { %146 = vst.msk [vmem:[#allocation3] sm:$0x1] %vm145_vm2, %v144_v52 }
  0xa4   :  { %157 = dma.vmem_to_hbm [thread:$0]  %s153_s18, 16, %s155_s21, [#allocation4]  }
  0xa5   :  { %200 = dma.done.wait [#allocation4], 16  }
  0xa6   :  { %201 = vsyncadd [#allocation4], 4294967280 }
  0xa7   :  { %162 = vsyncpa [#allocation4], 1 }

</bundles_post_ra>
